<compile_context>
chip_gen: v5e
topology: v5e:2x2
jax: 0.10.0
libtpu: 0.0.40
codegen_flags: <defaults>
</compile_context>

<pallas_src>
import math

import jax
import jax.numpy as jnp
from jax.experimental import pallas as pl
from jax.experimental.pallas import tpu as pltpu


_LANE = 128           # VMEM lane width: the D=24 feature axis pads to 128 lanes
_TM_HARD_CAP = 16384  # 4 stream bufs * 16384 rows * 128 lanes * 4 B = 32 MiB (v7x-safe)
_TARGET_STEPS = 4     # aim for >= 4 grid steps: megacore sharding + DMA overlap


def _ae_kernel(x_ref,
               w1_ref, b1_ref,
               w2_ref, b2_ref,
               w3_ref, b3_ref,
               w4_ref, b4_ref,
               o_ref):
    x = x_ref[...]

    # encoder: Linear(D,32) -> ReLU -> Linear(32,16)
    h = jnp.dot(x, w1_ref[...], preferred_element_type=jnp.float32) + b1_ref[...]
    h = jnp.maximum(h, 0.0)
    z = jnp.dot(h, w2_ref[...], preferred_element_type=jnp.float32) + b2_ref[...]

    # decoder: Linear(16,32) -> ReLU -> Linear(32,D)
    h = jnp.dot(z, w3_ref[...], preferred_element_type=jnp.float32) + b3_ref[...]
    h = jnp.maximum(h, 0.0)
    out = jnp.dot(h, w4_ref[...], preferred_element_type=jnp.float32) + b4_ref[...]

    o_ref[...] = out.astype(o_ref.dtype)


def _round_up(x, m):
    return ((x + m - 1) // m) * m


def _choose_tm(batch, tm):
    """Pick the batch tile: as big as VMEM allows, but keep >= ~4 grid steps
    (when the batch is big enough) so both v7x TensorCores get work."""
    tm = min(int(tm), _TM_HARD_CAP)
    per_step = _round_up(pl.cdiv(batch, _TARGET_STEPS), 8)
    tm_eff = max(8, min(_round_up(tm, 8), per_step))
    if tm_eff >= batch:
        tm_eff = batch            # single full-extent block (legal for any batch)
    return tm_eff


def autoencoder_linear_forward(x, params, *, tm=8192):
    """x: (B, n_feat*3) float32.  params: (in,out) weights, (1,out) biases."""
    B, D = x.shape
    TM = _choose_tm(B, tm)
    grid = (pl.cdiv(B, TM),)      # ragged last block: OOB writes are masked

    # Streamed, auto-double-buffered tiles for x / out.
    x_spec = pl.BlockSpec((TM, D), lambda i: (i, 0))
    out_spec = pl.BlockSpec((TM, D), lambda i: (i, 0))

    # Tiny weights/biases: whole arrays, VMEM-resident for the entire grid
    # (no per-step DMA, no redundant double-buffering).
    w_spec = pl.BlockSpec(memory_space=pltpu.MemorySpace.VMEM)
    weights = (params["w1"], params["b1"], params["w2"], params["b2"],
               params["w3"], params["b3"], params["w4"], params["b4"])

    # VMEM budget: x + out tiles, double-buffered, lane-padded 24 -> 128.
    stream_bytes = 2 * 2 * TM * _round_up(D, _LANE) * 4
    weight_bytes = sum(int(a.size) * 4 for a in weights)
    vmem_limit = min(48 << 20,
                     max(32 << 20, int(1.25 * stream_bytes) + weight_bytes + (1 << 20)))

    flops_per_row = 2 * (D * 32 + 32 * 16 + 16 * 32 + 32 * D)
    cost = pl.CostEstimate(
        flops=B * flops_per_row,
        transcendentals=0,
        bytes_accessed=2 * B * D * 4 + weight_bytes,
    )

    return pl.pallas_call(
        _ae_kernel,
        out_shape=jax.ShapeDtypeStruct((B, D), x.dtype),
        grid=grid,
        in_specs=[x_spec] + [w_spec] * len(weights),
        out_specs=out_spec,
        compiler_params=pltpu.CompilerParams(
            dimension_semantics=("parallel",),
            vmem_limit_bytes=vmem_limit),
        cost_estimate=cost,
    )(x, *weights)


def init_params(key, n_feat):
    """Deterministic init mimicking PyTorch nn.Linear default (+/- 1/sqrt(fan_in)).
    Weights stored transposed: (in_features, out_features)."""
    d_in = n_feat * 3
    dims = [(d_in, 32), (32, 16), (16, 32), (32, d_in)]
    params = {}
    keys = jax.random.split(key, 2 * len(dims))
    for i, (fin, fout) in enumerate(dims):
        bound = 1.0 / math.sqrt(fin)
        params[f"w{i + 1}"] = jax.random.uniform(
            keys[2 * i], (fin, fout), jnp.float32, -bound, bound)
        params[f"b{i + 1}"] = jax.random.uniform(
            keys[2 * i + 1], (1, fout), jnp.float32, -bound, bound)
    return params


def reference_forward(x, p):
    # Exact original 4-matmul formulation (encoder -> decoder).
    h = jnp.maximum(x @ p["w1"] + p["b1"], 0.0)
    z = h @ p["w2"] + p["b2"]
    h = jnp.maximum(z @ p["w3"] + p["b3"], 0.0)
    return h @ p["w4"] + p["b4"]


if __name__ == "__main__":
    n_feat = 8            # Linear input dim = n_feat * 3 = 24
    key = jax.random.PRNGKey(0)
    k_x, k_p, k_x2 = jax.random.split(key, 3)
    params = init_params(k_p, n_feat)

    # Small-batch check (single full-extent tile).
    batch = 8
    x = jax.random.normal(k_x, (batch, n_feat * 3), jnp.float32)
    out = jax.block_until_ready(autoencoder_linear_forward(x, params))
    ref = reference_forward(x, params)
    assert out.shape == (batch, n_feat * 3)
    assert jnp.allclose(out, ref, atol=1e-4, rtol=1e-4), "mismatch (small batch)"

    # Multi-step check: exercises the batch grid + ragged last block
    # (B=300, TM=80 -> 4 grid steps, last block only 60 valid rows).
    batch2 = 300
    x2 = jax.random.normal(k_x2, (batch2, n_feat * 3), jnp.float32)
    out2 = jax.block_until_ready(autoencoder_linear_forward(x2, params))
    ref2 = reference_forward(x2, params)
    assert out2.shape == (batch2, n_feat * 3)
    assert jnp.allclose(out2, ref2, atol=1e-4, rtol=1e-4), "mismatch (gridded batch)"

    print("KERNEL_OK")
</pallas_src>

<mosaic_0001>
module attributes {stable_mosaic.version = 11 : i64} {
  func.func @_ae_kernel(%arg0: i32, %arg1: memref<8x24xf32, #tpu.memory_space<vmem>>, %arg2: memref<24x32xf32, #tpu.memory_space<vmem>>, %arg3: memref<1x32xf32, #tpu.memory_space<vmem>>, %arg4: memref<32x16xf32, #tpu.memory_space<vmem>>, %arg5: memref<1x16xf32, #tpu.memory_space<vmem>>, %arg6: memref<16x32xf32, #tpu.memory_space<vmem>>, %arg7: memref<1x32xf32, #tpu.memory_space<vmem>>, %arg8: memref<32x24xf32, #tpu.memory_space<vmem>>, %arg9: memref<1x24xf32, #tpu.memory_space<vmem>>, %arg10: memref<8x24xf32, #tpu.memory_space<vmem>>) attributes {dimension_semantics = [#tpu.dimension_semantics<parallel>], iteration_bounds = array<i64: 1>, scalar_prefetch = 0 : i64, scratch_operands = 0 : i64, tpu.core_type = #tpu.core_type<tc>, window_params = [{transform_indices = @transform_0, window_bounds = array<i64: 8, 24>}, {pipeline_mode = #tpu.pipeline_mode<synchronous>, transform_indices = @transform_1, window_bounds = array<i64: 24, 32>}, {pipeline_mode = #tpu.pipeline_mode<synchronous>, transform_indices = @transform_2, window_bounds = array<i64: 1, 32>}, {pipeline_mode = #tpu.pipeline_mode<synchronous>, transform_indices = @transform_3, window_bounds = array<i64: 32, 16>}, {pipeline_mode = #tpu.pipeline_mode<synchronous>, transform_indices = @transform_4, window_bounds = array<i64: 1, 16>}, {pipeline_mode = #tpu.pipeline_mode<synchronous>, transform_indices = @transform_5, window_bounds = array<i64: 16, 32>}, {pipeline_mode = #tpu.pipeline_mode<synchronous>, transform_indices = @transform_6, window_bounds = array<i64: 1, 32>}, {pipeline_mode = #tpu.pipeline_mode<synchronous>, transform_indices = @transform_7, window_bounds = array<i64: 32, 24>}, {pipeline_mode = #tpu.pipeline_mode<synchronous>, transform_indices = @transform_8, window_bounds = array<i64: 1, 24>}, {transform_indices = @transform_9, window_bounds = array<i64: 8, 24>}]} {
    %c0 = arith.constant 0 : index
    %c0_0 = arith.constant 0 : index
    %0 = vector.load %arg1[%c0, %c0_0] : memref<8x24xf32, #tpu.memory_space<vmem>>, vector<8x24xf32>
    %c0_1 = arith.constant 0 : index
    %c0_2 = arith.constant 0 : index
    %1 = vector.load %arg2[%c0_1, %c0_2] : memref<24x32xf32, #tpu.memory_space<vmem>>, vector<24x32xf32>
    %cst = arith.constant dense<0.000000e+00> : vector<8x32xf32>
    %2 = tpu.matmul %0, %1, %cst {dimension_numbers = #tpu.dot_dimension_numbers<[1], [0], [0], [1], [0, 0, 1, 1], [], []>} : vector<8x24xf32>, vector<24x32xf32>, vector<8x32xf32> -> vector<8x32xf32>
    %c0_3 = arith.constant 0 : index
    %c0_4 = arith.constant 0 : index
    %3 = vector.load %arg3[%c0_3, %c0_4] : memref<1x32xf32, #tpu.memory_space<vmem>>, vector<1x32xf32>
    %4 = vector.broadcast %3 : vector<1x32xf32> to vector<8x32xf32>
    %5 = arith.addf %2, %4 : vector<8x32xf32>
    %cst_5 = arith.constant 0.000000e+00 : f32
    %6 = vector.broadcast %cst_5 : f32 to vector<8x32xf32>
    %7 = arith.maximumf %5, %6 : vector<8x32xf32>
    %c0_6 = arith.constant 0 : index
    %c0_7 = arith.constant 0 : index
    %8 = vector.load %arg4[%c0_6, %c0_7] : memref<32x16xf32, #tpu.memory_space<vmem>>, vector<32x16xf32>
    %cst_8 = arith.constant dense<0.000000e+00> : vector<8x16xf32>
    %9 = tpu.matmul %7, %8, %cst_8 {dimension_numbers = #tpu.dot_dimension_numbers<[1], [0], [0], [1], [0, 0, 1, 1], [], []>} : vector<8x32xf32>, vector<32x16xf32>, vector<8x16xf32> -> vector<8x16xf32>
    %c0_9 = arith.constant 0 : index
    %c0_10 = arith.constant 0 : index
    %10 = vector.load %arg5[%c0_9, %c0_10] : memref<1x16xf32, #tpu.memory_space<vmem>>, vector<1x16xf32>
    %11 = vector.broadcast %10 : vector<1x16xf32> to vector<8x16xf32>
    %12 = arith.addf %9, %11 : vector<8x16xf32>
    %c0_11 = arith.constant 0 : index
    %c0_12 = arith.constant 0 : index
    %13 = vector.load %arg6[%c0_11, %c0_12] : memref<16x32xf32, #tpu.memory_space<vmem>>, vector<16x32xf32>
    %cst_13 = arith.constant dense<0.000000e+00> : vector<8x32xf32>
    %14 = tpu.matmul %12, %13, %cst_13 {dimension_numbers = #tpu.dot_dimension_numbers<[1], [0], [0], [1], [0, 0, 1, 1], [], []>} : vector<8x16xf32>, vector<16x32xf32>, vector<8x32xf32> -> vector<8x32xf32>
    %c0_14 = arith.constant 0 : index
    %c0_15 = arith.constant 0 : index
    %15 = vector.load %arg7[%c0_14, %c0_15] : memref<1x32xf32, #tpu.memory_space<vmem>>, vector<1x32xf32>
    %16 = vector.broadcast %15 : vector<1x32xf32> to vector<8x32xf32>
    %17 = arith.addf %14, %16 : vector<8x32xf32>
    %cst_16 = arith.constant 0.000000e+00 : f32
    %18 = vector.broadcast %cst_16 : f32 to vector<8x32xf32>
    %19 = arith.maximumf %17, %18 : vector<8x32xf32>
    %c0_17 = arith.constant 0 : index
    %c0_18 = arith.constant 0 : index
    %20 = vector.load %arg8[%c0_17, %c0_18] : memref<32x24xf32, #tpu.memory_space<vmem>>, vector<32x24xf32>
    %cst_19 = arith.constant dense<0.000000e+00> : vector<8x24xf32>
    %21 = tpu.matmul %19, %20, %cst_19 {dimension_numbers = #tpu.dot_dimension_numbers<[1], [0], [0], [1], [0, 0, 1, 1], [], []>} : vector<8x32xf32>, vector<32x24xf32>, vector<8x24xf32> -> vector<8x24xf32>
    %c0_20 = arith.constant 0 : index
    %c0_21 = arith.constant 0 : index
    %22 = vector.load %arg9[%c0_20, %c0_21] : memref<1x24xf32, #tpu.memory_space<vmem>>, vector<1x24xf32>
    %23 = vector.broadcast %22 : vector<1x24xf32> to vector<8x24xf32>
    %24 = arith.addf %21, %23 : vector<8x24xf32>
    %c0_22 = arith.constant 0 : index
    %c0_23 = arith.constant 0 : index
    %25 = vector.load %arg10[%c0_22, %c0_23] : memref<8x24xf32, #tpu.memory_space<vmem>>, vector<8x24xf32>
    tpu.vector_store %arg10[%c0_22, %c0_23], %24 {strides = array<i32>} : memref<8x24xf32, #tpu.memory_space<vmem>>, vector<8x24xf32>,
    return
  }
  func.func @transform_0(%arg0: i32) -> (i32, i32) {
    %c0_i32 = arith.constant 0 : i32
    %c0_i32_0 = arith.constant 0 : i32
    return %arg0, %c0_i32 : i32, i32
  }
  func.func @transform_1(%arg0: i32) -> (i32, i32) {
    %c0_i32 = arith.constant 0 : i32
    %c0_i32_0 = arith.constant 0 : i32
    %c0_i32_1 = arith.constant 0 : i32
    return %c0_i32, %c0_i32_0 : i32, i32
  }
  func.func @transform_2(%arg0: i32) -> (i32, i32) {
    %c0_i32 = arith.constant 0 : i32
    %c0_i32_0 = arith.constant 0 : i32
    %c0_i32_1 = arith.constant 0 : i32
    return %c0_i32, %c0_i32_0 : i32, i32
  }
  func.func @transform_3(%arg0: i32) -> (i32, i32) {
    %c0_i32 = arith.constant 0 : i32
    %c0_i32_0 = arith.constant 0 : i32
    %c0_i32_1 = arith.constant 0 : i32
    return %c0_i32, %c0_i32_0 : i32, i32
  }
  func.func @transform_4(%arg0: i32) -> (i32, i32) {
    %c0_i32 = arith.constant 0 : i32
    %c0_i32_0 = arith.constant 0 : i32
    %c0_i32_1 = arith.constant 0 : i32
    return %c0_i32, %c0_i32_0 : i32, i32
  }
  func.func @transform_5(%arg0: i32) -> (i32, i32) {
    %c0_i32 = arith.constant 0 : i32
    %c0_i32_0 = arith.constant 0 : i32
    %c0_i32_1 = arith.constant 0 : i32
    return %c0_i32, %c0_i32_0 : i32, i32
  }
  func.func @transform_6(%arg0: i32) -> (i32, i32) {
    %c0_i32 = arith.constant 0 : i32
    %c0_i32_0 = arith.constant 0 : i32
    %c0_i32_1 = arith.constant 0 : i32
    return %c0_i32, %c0_i32_0 : i32, i32
  }
  func.func @transform_7(%arg0: i32) -> (i32, i32) {
    %c0_i32 = arith.constant 0 : i32
    %c0_i32_0 = arith.constant 0 : i32
    %c0_i32_1 = arith.constant 0 : i32
    return %c0_i32, %c0_i32_0 : i32, i32
  }
  func.func @transform_8(%arg0: i32) -> (i32, i32) {
    %c0_i32 = arith.constant 0 : i32
    %c0_i32_0 = arith.constant 0 : i32
    %c0_i32_1 = arith.constant 0 : i32
    return %c0_i32, %c0_i32_0 : i32, i32
  }
  func.func @transform_9(%arg0: i32) -> (i32, i32) {
    %c0_i32 = arith.constant 0 : i32
    %c0_i32_0 = arith.constant 0 : i32
    return %arg0, %c0_i32 : i32, i32
  }
}

</mosaic_0001>

<bundles_post_ra>
// kernel: tpu_custom_call.1
= control target key start
LH: loop header
LB: loop body
LE: loop exit
PB: predicated region body
PF: predicated region fallthrough
CT: control target
= control target key end

     0   :  { %vm41_vm0 = vcmask 195584   ;;  %s324_s0 = inlined_call_operand.vmem [shape: f32[8,24], index: 0, kind: input, shape index: {}]   ;;  %s325_s1 = inlined_call_operand.vmem [shape: f32[24,32], index: 1, kind: input, shape index: {}]   ;;  %s326_s2 = inlined_call_operand.vmem [shape: f32[1,32], index: 2, kind: input, shape index: {}]   ;;  %s327_s3 = inlined_call_operand.vmem [shape: f32[32,16], index: 3, kind: input, shape index: {}]   ;;  %s328_s4 = inlined_call_operand.vmem [shape: f32[1,16], index: 4, kind: input, shape index: {}]   ;;  %s329_s5 = inlined_call_operand.vmem [shape: f32[16,32], index: 5, kind: input, shape index: {}]   ;;  %s330_s6 = inlined_call_operand.vmem [shape: f32[1,32], index: 6, kind: input, shape index: {}]   ;;  %s331_s7 = inlined_call_operand.vmem [shape: f32[32,24], index: 7, kind: input, shape index: {}]   ;;  %s332_s8 = inlined_call_operand.vmem [shape: f32[1,24], index: 8, kind: input, shape index: {}]   ;;  %s333_s9 = inlined_call_operand.hbm [shape: f32[8,24], index: 9, kind: output, shape index: {}]  }
   0x1   :  { %v36_v0 = vld [vmem:[%s325_s1 + $0x10] sm:$0xff]  ;;  %v35_v1 = vld [vmem:[%s325_s1 + $0x8] sm:$0xff]  ;;  %v69_v2 = vld [vmem:[%s327_s3 + $0x18] sm:$0xff] }
   0x2   :  { %58 = vmatpush.msra.mxu0 %v36_v0  ;;  %v34_v3 = vld [vmem:[%s325_s1] sm:$0xff]  ;;  %90 = vmatpush.msra.mxu1 %v69_v2 }
   0x3   :  { %v33_v4 = vld [vmem:[%s324_s0] sm:$0xff] }
   0x4   :  { %59 = vmatpush.msra.mxu0 %v35_v1 }
   0x5   :  { %14 = vsyncpa [#allocation3], 0  ;;  %v68_v5 = vld [vmem:[%s327_s3 + $0x10] sm:$0xff]  ;;  %v67_v6 = vld [vmem:[%s327_s3 + $0x8] sm:$0xff]  ;;  %vm74_vm1 = vcmask 261120   ;;  %vm104_vm2 = vcmask 130048  }
   0x6   :  { %60 = vmatpush.msra.mxu0 %v34_v3  ;;  %91 = vmatpush.msra.mxu1 %v68_v5  ;;  %v66_v7 = vld [vmem:[%s327_s3] sm:$0xff]  ;;  %v99_v12 = vld [vmem:[%s329_s5 + $0x8] sm:$0xff]  ;;  %v132_v14 = vld [vmem:[%s331_s7 + $0x18] sm:$0xff]  ;;  %s212_s18 = smov [#allocation2]  }
   0x7   :  { %177 = vmatmul.msk.f32.vlgmr.msra.gmra.mxu0 %vm41_vm0, %v33_v4  ;;  %v182_v8 = vld [vmem:[%s326_s2] ss:$0 sm:$0xff]  ;;  %122 = vmatpush.msra.mxu2 %v99_v12  ;;  %v131_v18 = vld [vmem:[%s331_s7 + $0x10] sm:$0xff]  ;;  %v130_v19 = vld [vmem:[%s331_s7 + $0x8] sm:$0xff]  ;;  %s166_s19 = sshll.u32 %s212_s18, 4  ;;  %s167_s19 = int_to_ptr.vmem [resolvable:$true] %s166_s19 }
   0x8   :  { %92 = vmatpush.msra.mxu1 %v67_v6  ;;  %v98_v13 = vld [vmem:[%s329_s5] sm:$0xff]  ;;  %152 = vmatpush.msra.mxu3 %v132_v14 }
   0x9   :  { %123 = vmatpush.msra.mxu2 %v98_v13  ;;  %v183_v15 = vld [vmem:[%s328_s4] ss:$0 sm:$0xff] }
   0xa   :  { %93 = vmatpush.msra.mxu1 %v66_v7  ;;  %153 = vmatpush.msra.mxu3 %v131_v18  ;;  %v129_v20 = vld [vmem:[%s331_s7] sm:$0xff]  ;;  %s168_s7 = sshll.u32 %s333_s9, 4  ;;  %s169_s7 = int_to_ptr.hbm [resolvable:$true] %s168_s7 }
   0xb   :  { %v184_v21 = vld [vmem:[%s330_s6] ss:$0 sm:$0xff] }
   0xc   :  { %154 = vmatpush.msra.mxu3 %v130_v19  ;;  %v185_v25 = vld [vmem:[%s332_s8] ss:$0 sm:$0xff] }
   0xe   :  { %155 = vmatpush.msra.mxu3 %v129_v20 }
  0x84   :  { %v62_v9 = vpop.f32.mrf.mxu0 }
  0x85   :  { %v63_v10 = vadd.f32 %v182_v8, %v62_v9 }
  0x87   :  { %v65_v11 = vmax.f32 %v63_v10, 0.0 }
  0x89   :  { %178 = vmatmul.msk.f32.vlgmr.msra.gmra.mxu1 %vm74_vm1, %v65_v11 }
 0x106   :  { %v95_v16 = vpop.f32.mrf.mxu1 }
 0x107   :  { %v96_v17 = vadd.f32 %v183_v15, %v95_v16 }
 0x109   :  { %179 = vmatmul.msk.f32.vlgmr.msra.gmra.mxu2 %vm104_vm2, %v96_v17 }
 0x18c   :  { %v125_v22 = vpop.f32.mrf.mxu2 }
 0x18d   :  { %v126_v23 = vadd.f32 %v184_v21, %v125_v22 }
 0x18f   :  { %v128_v24 = vmax.f32 %v126_v23, 0.0 }
 0x191   :  { %180 = vmatmul.msk.f32.vlgmr.msra.gmra.mxu3 %vm74_vm1, %v128_v24 }
 0x214   :  { %v157_v26 = vpop.f32.mrf.mxu3 }
 0x215   :  { %v158_v27 = vadd.f32 %v185_v25, %v157_v26 }
 0x217   :  { %160 = vst.msk [vmem:[#allocation2] sm:$0xff] %vm41_vm0, %v158_v27 }
 0x218   :  { %171 = dma.vmem_to_hbm [thread:$0]  %s167_s19, 128, %s169_s7, [#allocation3]  }
 0x219   :  { %210 = dma.done.wait [#allocation3], 128  }
 0x21a   :  { %211 = vsyncadd [#allocation3], 4294967168 }
 0x21b   :  { %176 = vsyncpa [#allocation3], 1 }

</bundles_post_ra>
